<compile_context>
chip_gen: v5e
topology: v5e:2x2
jax: 0.10.0
libtpu: 0.0.40
codegen_flags: <defaults>
</compile_context>

<pallas_src>
import functools

import numpy as np
import jax
import jax.numpy as jnp
from jax.experimental import pallas as pl
from jax.experimental.pallas import tpu as pltpu


# ---------------------------------------------------------------------------
# small helpers
# ---------------------------------------------------------------------------

def _round_up(n, m):
    return ((n + m - 1) // m) * m


def _pick_tile(n, max_tile):
    """Largest multiple of 128 that divides n and is <= max_tile (n must be a multiple of 128)."""
    assert n > 0 and n % 128 == 0, n
    t = max(128, (min(max_tile, n) // 128) * 128)
    while n % t:
        t -= 128
    return t


def build_ls(max_degree, number_of_sh_coefficients):
    ls = np.zeros(number_of_sh_coefficients, dtype=np.int32)
    for degree in range(0, max_degree + 1, 2):
        for order in range(-degree, degree + 1):
            ls[int(0.5 * degree * (degree + 1) + order)] = degree
    return jnp.asarray(ls)


def number_of_coefficients(max_degree):
    # highest index written by the ls construction above, plus one
    return int(0.5 * max_degree * (max_degree + 1)) + max_degree + 1


def xavier_uniform(key, shape):
    # torch.nn.init.xavier_uniform_ on (O, I, D): fan_in = I*D, fan_out = O*D
    O, I, D = shape
    bound = float(np.sqrt(6.0 / ((I + O) * D)))
    return jax.random.uniform(key, shape, jnp.float32, -bound, bound)


# ---------------------------------------------------------------------------
# SphericalConvolution kernel: C-batched (O,I) @ (I, B_tile) on the MXU
# ---------------------------------------------------------------------------

def _sph_conv_kernel(w_ref, x_ref, o_ref):
    # w_ref: (C, O, I)   scaled, expanded weights (resident across the whole grid)
    # x_ref: (C, I, Bt)  one batch tile, B on the 128-lane axis
    # o_ref: (C, O, Bt)  lane-dense output tile
    o_ref[...] = jnp.einsum(
        "coi,cib->cob", w_ref[...], x_ref[...],
        preferred_element_type=jnp.float32,      # f32 accumulation on the MXU
    ).astype(o_ref.dtype)


def spherical_convolution_cmajor(x_cib, weights, ls, *, b_tile=512):
    """x_cib: (C, I, Bp) activations in C-major layout (Bp a multiple of 128).
    weights: (O, I, max_degree//2 + 1) f32.  Returns (C, O, Bp) in x_cib.dtype."""
    C, I, Bp = x_cib.shape
    O = weights.shape[0]

    # Parameter glue (tiny, plain JAX): gather per-coefficient weights, fold in the
    # sqrt(pi/(2l+1)) scale in f32, transpose to (C, O, I), downcast to the activation dtype.
    scale = jnp.sqrt(jnp.pi / (2.0 * ls.astype(jnp.float32) + 1.0))        # (C,)
    w_exp = weights[:, :, (ls // 2).astype(jnp.int32)]                     # (O, I, C)
    w_coi = jnp.transpose(w_exp * scale[None, None, :], (2, 0, 1)).astype(x_cib.dtype)

    bt = _pick_tile(Bp, b_tile)
    grid = (Bp // bt,)
    return pl.pallas_call(
        _sph_conv_kernel,
        out_shape=jax.ShapeDtypeStruct((C, O, Bp), x_cib.dtype),
        grid=grid,
        in_specs=[
            pl.BlockSpec((C, O, I), lambda b: (0, 0, 0)),   # weights: constant block -> resident
            pl.BlockSpec((C, I, bt), lambda b: (0, 0, b)),  # stream x over B tiles
        ],
        out_specs=pl.BlockSpec((C, O, bt), lambda b: (0, 0, b)),
        compiler_params=pltpu.CompilerParams(dimension_semantics=("parallel",)),
    )(w_coi, x_cib)


def spherical_convolution(x, weights, ls, *, b_tile=512, compute_dtype=jnp.bfloat16):
    """PyTorch-layout API: x (B, I, C) -> (B, O, C) in x.dtype."""
    B = x.shape[0]
    Bp = _round_up(B, 128)
    x_cib = jnp.transpose(x, (2, 1, 0)).astype(compute_dtype)              # (C, I, B)
    if Bp != B:
        x_cib = jnp.pad(x_cib, ((0, 0), (0, 0), (0, Bp - B)))
    out_cob = spherical_convolution_cmajor(x_cib, weights, ls, b_tile=b_tile)
    return jnp.transpose(out_cob, (2, 1, 0))[:B].astype(x.dtype)           # (B, O, C)


# ---------------------------------------------------------------------------
# Nonlinearity kernel:  y = sft @ relu(isft @ x)   per (channel, voxel) column
# ---------------------------------------------------------------------------

def _nonlinearity_kernel(isft_ref, sft_ref, x_ref, o_ref):
    # isft_ref: (V, C), sft_ref: (C, V)  -- resident.  x_ref/o_ref: (C, Nt), N = channels*B.
    z = jnp.dot(isft_ref[...], x_ref[...], preferred_element_type=jnp.float32)   # (V, Nt)
    z = jnp.maximum(z, 0.0).astype(x_ref.dtype)                                  # relu in f32
    o_ref[...] = jnp.dot(sft_ref[...], z,
                         preferred_element_type=jnp.float32).astype(o_ref.dtype)


def nonlinearity_cmajor(x_chb, sft, isft, *, n_tile=4096):
    """x_chb: (C, CH, Bp).  Returns sft @ relu(isft @ x) with the same shape/dtype."""
    C, CH, Bp = x_chb.shape
    V = isft.shape[0]
    N = CH * Bp
    x2 = x_chb.reshape(C, N)                       # flatten (channel, voxel) onto lanes
    nt = _pick_tile(N, n_tile)
    grid = (N // nt,)
    isft_c = isft.astype(x_chb.dtype)
    sft_c = sft.astype(x_chb.dtype)
    y2 = pl.pallas_call(
        _nonlinearity_kernel,
        out_shape=jax.ShapeDtypeStruct((C, N), x_chb.dtype),
        grid=grid,
        in_specs=[
            pl.BlockSpec((V, C), lambda n: (0, 0)),     # isft: resident
            pl.BlockSpec((C, V), lambda n: (0, 0)),     # sft:  resident
            pl.BlockSpec((C, nt), lambda n: (0, n)),    # stream activations
        ],
        out_specs=pl.BlockSpec((C, nt), lambda n: (0, n)),
        compiler_params=pltpu.CompilerParams(dimension_semantics=("parallel",)),
    )(isft_c, sft_c, x2)
    return y2.reshape(C, CH, Bp)


# ---------------------------------------------------------------------------
# Full SCNNModel forward
# ---------------------------------------------------------------------------

def scnn_forward(x, params, ls, sft, isft, *, b_tile=512, n_tile=4096,
                 compute_dtype=jnp.bfloat16):
    """x: (B, number_of_shells, C) f32.  Returns squeeze((B, output_size, C)) f32."""
    B, _, C = x.shape
    Bp = _round_up(B, 128)
    # Single layout change at the model boundary: (B, ch, C) -> C-major (C, ch, Bp).
    h = jnp.transpose(x, (2, 1, 0)).astype(compute_dtype)
    if Bp != B:
        h = jnp.pad(h, ((0, 0), (0, 0), (0, Bp - B)))

    conv = functools.partial(spherical_convolution_cmajor, ls=ls, b_tile=b_tile)
    nl = functools.partial(nonlinearity_cmajor, sft=sft, isft=isft, n_tile=n_tile)

    e1 = nl(conv(h, weights=params["encoder1"]))
    e2 = nl(conv(e1, weights=params["encoder2"]))
    e3 = nl(conv(e2, weights=params["encoder3"]))
    e4 = nl(conv(e3, weights=params["encoder4"]))

    d1 = nl(jnp.concatenate([conv(e4, weights=params["decoder1"]), e3], axis=1))
    d2 = nl(jnp.concatenate([conv(d1, weights=params["decoder2"]), e2], axis=1))
    d3 = nl(jnp.concatenate([conv(d2, weights=params["decoder3"]), e1], axis=1))
    d4 = nl(conv(d3, weights=params["decoder4"]))
    d5 = conv(d4, weights=params["decoder5"])                      # (C, output_size, Bp)

    out = jnp.transpose(d5, (2, 1, 0))[:B].astype(jnp.float32)     # (B, output_size, C)
    return jnp.squeeze(out)


# ---------------------------------------------------------------------------
# Pure-JAX references (mirror the bf16-input / f32-accumulate numerics)
# ---------------------------------------------------------------------------

def _sph_conv_ref(x, weights, ls, compute_dtype):
    scale = jnp.sqrt(jnp.pi / (2.0 * ls.astype(jnp.float32) + 1.0))
    w = (weights[:, :, (ls // 2).astype(jnp.int32)] * scale[None, None, :]).astype(compute_dtype)
    return jnp.einsum("oic,bic->boc", w, x,
                      preferred_element_type=jnp.float32).astype(compute_dtype)


def _nonlinearity_ref(x, sft, isft, compute_dtype):
    z = jnp.einsum("vc,bhc->bhv", isft.astype(compute_dtype), x,
                   preferred_element_type=jnp.float32)
    z = jnp.maximum(z, 0.0).astype(compute_dtype)
    return jnp.einsum("cv,bhv->bhc", sft.astype(compute_dtype), z,
                      preferred_element_type=jnp.float32).astype(compute_dtype)


def scnn_forward_ref(x, params, ls, sft, isft, compute_dtype=jnp.bfloat16):
    h = x.astype(compute_dtype)
    conv = lambda a, name: _sph_conv_ref(a, params[name], ls, compute_dtype)
    nl = lambda a: _nonlinearity_ref(a, sft, isft, compute_dtype)
    e1 = nl(conv(h, "encoder1"))
    e2 = nl(conv(e1, "encoder2"))
    e3 = nl(conv(e2, "encoder3"))
    e4 = nl(conv(e3, "encoder4"))
    d1 = nl(jnp.concatenate([conv(e4, "decoder1"), e3], axis=1))
    d2 = nl(jnp.concatenate([conv(d1, "decoder2"), e2], axis=1))
    d3 = nl(jnp.concatenate([conv(d2, "decoder3"), e1], axis=1))
    d4 = nl(conv(d3, "decoder4"))
    d5 = conv(d4, "decoder5").astype(jnp.float32)
    return jnp.squeeze(d5)


def _assert_close(name, got, want, tol):
    got = np.asarray(got, dtype=np.float64)
    want = np.asarray(want, dtype=np.float64)
    assert got.shape == want.shape, f"{name}: shape {got.shape} vs {want.shape}"
    scale = float(np.max(np.abs(want))) + 1e-12
    err = float(np.max(np.abs(got - want))) / scale
    assert err < tol, f"{name}: normalized max error {err:.3e} >= {tol:.1e}"


# ---------------------------------------------------------------------------
# demo / self-test
# ---------------------------------------------------------------------------

if __name__ == "__main__":
    max_degree = 4
    C = number_of_coefficients(max_degree)     # 15 SH coefficients
    D = max_degree // 2 + 1                    # 3 distinct even degrees
    n_shells = 4                               # input channels
    output_size = 8
    V = 64                                     # gradient directions for sft/isft
    B = 512                                    # voxels (batch) -- small but multi-tile

    ls = build_ls(max_degree, C)

    key = jax.random.PRNGKey(0)
    keys = jax.random.split(key, 16)

    layer_dims = {
        "encoder1": (16, n_shells), "encoder2": (32, 16), "encoder3": (64, 32),
        "encoder4": (128, 64),
        "decoder1": (64, 128), "decoder2": (32, 128), "decoder3": (16, 64),
        "decoder4": (16, 32), "decoder5": (output_size, 16),
    }
    params = {name: xavier_uniform(keys[i], (o, i_ch, D))
              for i, (name, (o, i_ch)) in enumerate(layer_dims.items())}

    sft = jax.random.normal(keys[10], (C, V), jnp.float32) * (2.0 / np.sqrt(V))
    isft = jax.random.normal(keys[11], (V, C), jnp.float32) * (2.0 / np.sqrt(C))
    x = jax.random.normal(keys[12], (B, n_shells, C), jnp.float32)

    # --- single SphericalConvolution layer: Pallas vs reference ------------------
    y = jax.block_until_ready(spherical_convolution(x, params["encoder1"], ls, b_tile=256))
    assert y.shape == (B, 16, C)
    y_ref = _sph_conv_ref(x.astype(jnp.bfloat16), params["encoder1"], ls,
                          jnp.bfloat16).astype(jnp.float32)
    _assert_close("spherical_convolution", y, y_ref, tol=1e-2)

    # --- full SCNNModel forward ---------------------------------------------------
    fwd = jax.jit(functools.partial(scnn_forward, ls=ls, sft=sft, isft=isft,
                                    b_tile=256, n_tile=2048))
    out = jax.block_until_ready(fwd(x, params))
    assert out.shape == (B, output_size, C)
    ref = jax.block_until_ready(scnn_forward_ref(x, params, ls, sft, isft))
    _assert_close("scnn_forward", out, ref, tol=2e-2)

    print("KERNEL_OK")
</pallas_src>

<mosaic_0001>
module attributes {stable_mosaic.version = 11 : i64} {
  func.func @_sph_conv_kernel(%arg0: i32, %arg1: memref<15x16x4xbf16, #tpu.memory_space<vmem>>, %arg2: memref<15x4x256xbf16, #tpu.memory_space<vmem>>, %arg3: memref<15x16x256xbf16, #tpu.memory_space<vmem>>) attributes {dimension_semantics = [#tpu.dimension_semantics<parallel>], iteration_bounds = array<i64: 2>, scalar_prefetch = 0 : i64, scratch_operands = 0 : i64, tpu.core_type = #tpu.core_type<tc>, window_params = [{pipeline_mode = #tpu.pipeline_mode<synchronous>, transform_indices = @transform_0, window_bounds = array<i64: 15, 16, 4>}, {transform_indices = @transform_1, window_bounds = array<i64: 15, 4, 256>}, {transform_indices = @transform_2, window_bounds = array<i64: 15, 16, 256>}]} {
    %c0 = arith.constant 0 : index
    %c0_0 = arith.constant 0 : index
    %c0_1 = arith.constant 0 : index
    %0 = vector.load %arg1[%c0, %c0_0, %c0_1] : memref<15x16x4xbf16, #tpu.memory_space<vmem>>, vector<15x16x4xbf16>
    %c0_2 = arith.constant 0 : index
    %c0_3 = arith.constant 0 : index
    %c0_4 = arith.constant 0 : index
    %1 = vector.load %arg2[%c0_2, %c0_3, %c0_4] : memref<15x4x256xbf16, #tpu.memory_space<vmem>>, vector<15x4x256xbf16>
    "tpu.trace_start"() <{level = 10 : i32, message = "coi,cib->cob"}> : () -> ()
    %cst = arith.constant dense<0.000000e+00> : vector<15x16x256xf32>
    %2 = tpu.matmul %0, %1, %cst {dimension_numbers = #tpu.dot_dimension_numbers<[2], [1], [1], [2], [0, 0, 0, 1, 1, 2], [0], [0]>} : vector<15x16x4xbf16>, vector<15x4x256xbf16>, vector<15x16x256xf32> -> vector<15x16x256xf32>
    "tpu.trace_stop"() : () -> ()
    %3 = arith.truncf %2 : vector<15x16x256xf32> to vector<15x16x256xbf16>
    %c0_5 = arith.constant 0 : index
    %c0_6 = arith.constant 0 : index
    %c0_7 = arith.constant 0 : index
    %4 = vector.load %arg3[%c0_5, %c0_6, %c0_7] : memref<15x16x256xbf16, #tpu.memory_space<vmem>>, vector<15x16x256xbf16>
    tpu.vector_store %arg3[%c0_5, %c0_6, %c0_7], %3 {strides = array<i32>} : memref<15x16x256xbf16, #tpu.memory_space<vmem>>, vector<15x16x256xbf16>,
    return
  }
  func.func @transform_0(%arg0: i32) -> (i32, i32, i32) {
    %c0_i32 = arith.constant 0 : i32
    %c0_i32_0 = arith.constant 0 : i32
    %c0_i32_1 = arith.constant 0 : i32
    %c0_i32_2 = arith.constant 0 : i32
    return %c0_i32, %c0_i32_0, %c0_i32_1 : i32, i32, i32
  }
  func.func @transform_1(%arg0: i32) -> (i32, i32, i32) {
    %c0_i32 = arith.constant 0 : i32
    %c0_i32_0 = arith.constant 0 : i32
    %c0_i32_1 = arith.constant 0 : i32
    return %c0_i32, %c0_i32_0, %arg0 : i32, i32, i32
  }
  func.func @transform_2(%arg0: i32) -> (i32, i32, i32) {
    %c0_i32 = arith.constant 0 : i32
    %c0_i32_0 = arith.constant 0 : i32
    %c0_i32_1 = arith.constant 0 : i32
    return %c0_i32, %c0_i32_0, %arg0 : i32, i32, i32
  }
}

</mosaic_0001>

<bundles_post_ra>
// kernel: tpu_custom_call.1
= control target key start
LH: loop header
LB: loop body
LE: loop exit
PB: predicated region body
PF: predicated region fallthrough
CT: control target
= control target key end

     0   :  { %7 = vsyncpa [#allocation4], 0  ;;  %s1593_s0 = inlined_call_operand.vmem [shape: bf16[15,16,4], index: 0, kind: input, shape index: {}]   ;;  %s1594_s1 = inlined_call_operand.vmem [shape: bf16[15,4,512], index: 1, kind: input, shape index: {}]   ;;  %s1595_s2 = inlined_call_operand.hbm [shape: bf16[15,16,512], index: 2, kind: output, shape index: {}]  }
   0x1   :  { %9 = vsyncpa [#allocation4 + $0x1], 0  ;;  %s1340_s9 = smov 0   ;;  %s1342_s10 = smov 0  }
   0x2   :  { %s1344_s11 = smov 0   ;;  %s1346_s12 = smov 0  }
   0x3 LB: > { %s1095_s13 = sadd.s32 4294967295, %s1320_s12   ;;  %s1096_s14 = sadd.s32 4294967294, %s1320_s12   ;;  %s1320_s12 = sphi %s1346_s12, %s1601_s12   ;;  %s1316_s11 = sphi %s1344_s11, %s1600_s11   ;;  %s1312_s10 = sphi %s1342_s10, %s1599_s10   ;;  %s1308_s9 = sphi %s1340_s9, %s1598_s9  }
   0x4   : > { %s1363_s15 = sadd.s32 1, %s1320_s12   ;;  %s43_s16 = sadd.s32 1, %s1316_s11 }
   0x5   : > { %s40_s17 = ssub.s32 %s1320_s12, %s1363_s15  ;;  %p50_p0 = scmp.ne.s32.totalorder %s1316_s11, %s1312_s10 }
   0x6   : > { %p41_p1 = scmp.eq.s32.totalorder %s40_s17, 0  ;;  %p51_p2 = scmp.eq.s32.totalorder %s1320_s12, 0 }
   0x7   : > { %p80_p3 = scmp.eq.s32.totalorder %s1095_s13, 1  ;;  %p85_p4 = scmp.ne.s32.totalorder %s1312_s10, %s1308_s9 }
   0x8   : > { %s1376_s18 = scalar_select %p41_p1, %s1316_s11, %s43_s16  }
   0x9   : > { %p52_p5 = por %p51_p2, %p50_p0  ;;  %p1378_p6 = por %p80_p3, %p50_p0 }
   0xa   : > { %p86_p7 = scmp.eq.s32.totalorder %s1096_s14, 1  ;;  %p1098_p9 = scmp.ge.s32.totalorder %s1320_s12, 2 }
   0xc   : > { %p1382_p8 = por %p86_p7, %p85_p4  ;;  %105 = sbr.rel (%p1098_p9) target bundleno = 37 (0x25), region = 20 }
  0x11   : > { %108 = sbr.rel (!%p52_p5) target bundleno = 37 (0x25), region = 24  ;;  %s110_s21 = sand.u32 (%p52_p5), 1, %s1316_s11  }
  0x12   : > { %s1196_s22 = sshll.u32 (%p52_p5), %s1320_s12, 2  ;;  %s1213_s23 = smul.u32 (%p52_p5), 60, %s110_s21 }
  0x13   : > { %s115_s26 = scalar_lea.vmem (%p52_p5), %s1594_s1, %s1196_s22 }
  0x14   : > { %v132_v0 = vld [vmem:[%s115_s26] sm:$0xf] (%p52_p5)  ;;  %v134_v1 = vld [vmem:[%s115_s26 + $0x8] sm:$0xf] (%p52_p5)  ;;  %v136_v2 = vld [vmem:[%s115_s26 + $0x10] sm:$0xf] (%p52_p5) }
  0x15   : > { %s112_s27 = scalar_lea.vmem (%p52_p5), [#allocation2], %s1213_s23  ;;  %v138_v3 = vld [vmem:[%s115_s26 + $0x18] sm:$0xf] (%p52_p5)  ;;  %v140_v4 = vld [vmem:[%s115_s26 + $0x20] sm:$0xf] (%p52_p5) }
  0x16   : > { %133 = vst [vmem:[%s112_s27] sm:$0xf] %v132_v0  ;;  %v142_v5 = vld [vmem:[%s115_s26 + $0x28] sm:$0xf]  ;;  %v144_v6 = vld [vmem:[%s115_s26 + $0x30] sm:$0xf] }
  0x17   : > { %135 = vst [vmem:[%s112_s27 + $0x4] sm:$0xf] %v134_v1  ;;  %v146_v7 = vld [vmem:[%s115_s26 + $0x38] sm:$0xf]  ;;  %v148_v8 = vld [vmem:[%s115_s26 + $0x40] sm:$0xf] }
  0x18   : > { %137 = vst [vmem:[%s112_s27 + $0x8] sm:$0xf] %v136_v2  ;;  %v150_v9 = vld [vmem:[%s115_s26 + $0x48] sm:$0xf]  ;;  %v152_v10 = vld [vmem:[%s115_s26 + $0x50] sm:$0xf] }
  0x19   : > { %139 = vst [vmem:[%s112_s27 + $0xc] sm:$0xf] %v138_v3  ;;  %v154_v11 = vld [vmem:[%s115_s26 + $0x58] sm:$0xf]  ;;  %v156_v12 = vld [vmem:[%s115_s26 + $0x60] sm:$0xf] }
  0x1a   : > { %141 = vst [vmem:[%s112_s27 + $0x10] sm:$0xf] %v140_v4  ;;  %v158_v13 = vld [vmem:[%s115_s26 + $0x68] sm:$0xf]  ;;  %v160_v14 = vld [vmem:[%s115_s26 + $0x70] sm:$0xf] }
  0x1b   : > { %143 = vst [vmem:[%s112_s27 + $0x14] sm:$0xf] %v142_v5 }
  0x1c   : > { %145 = vst [vmem:[%s112_s27 + $0x18] sm:$0xf] %v144_v6 }
  0x1d   : > { %147 = vst [vmem:[%s112_s27 + $0x1c] sm:$0xf] %v146_v7 }
  0x1e   : > { %149 = vst [vmem:[%s112_s27 + $0x20] sm:$0xf] %v148_v8 }
  0x1f   : > { %151 = vst [vmem:[%s112_s27 + $0x24] sm:$0xf] %v150_v9 }
  0x20   : > { %153 = vst [vmem:[%s112_s27 + $0x28] sm:$0xf] %v152_v10 }
  0x21   : > { %155 = vst [vmem:[%s112_s27 + $0x2c] sm:$0xf] %v154_v11 }
  0x22   : > { %157 = vst [vmem:[%s112_s27 + $0x30] sm:$0xf] %v156_v12 }
  0x23   : > { %159 = vst [vmem:[%s112_s27 + $0x34] sm:$0xf] %v158_v13 }
  0x24   : > { %161 = vst [vmem:[%s112_s27 + $0x38] sm:$0xf] %v160_v14 }
  0x25 PF: > { %p1101_p10 = scmp.ge.s32.totalorder %s1320_s12, 1  ;;  %p214_p11 = scmp.lt.s32.totalorder %s1320_s12, 3 }
  0x27   : > { %p215_p12 = pnand %p1101_p10, %p214_p11 }
  0x28   : > { %s1397_s28 = sand.u32 (!%p215_p12), 1, %s1312_s10   ;;  %s1212_s26 = sshll.u32 (!%p215_p12), %s1095_s13, 3 }
  0x29   : > { %218 = sbr.rel (%p215_p12) target bundleno = 312 (0x138), region = 65  ;;  %s1024_s3 = scalar_lea.hbm (!%p215_p12), %s1595_s2, %s1212_s26 }
  0x2a   : > { %s1214_s29 = smul.u32 (!%p215_p12), 60, %s1397_s28  ;;  %s1559_s5 = sshll.u32 (!%p215_p12), %s1024_s3, 4  ;;  %s1028_s5 = int_to_ptr.hbm [resolvable:$true] %s1559_s5 }
  0x2b   : > { %s1215_s24 = smul.u32 (!%p215_p12), 240, %s1397_s28  ;;  %s1013_s13 = scalar_lea.sflag (!%p215_p12), [#allocation4], %s1397_s28 }
  0x2c   : > { %s1400_s30 = scalar_lea.vmem (!%p215_p12), [#allocation2], %s1214_s29  ;;  %s1272_s6 = sshra.s32 (!%p215_p12), %s1028_s5, 4  ;;  %s1273_s6 = int_to_ptr.hbm [resolvable:$true] %s1272_s6 }
  0x2d   : > { %s1523_s25 = scalar_lea.vmem (!%p215_p12), [#allocation3], %s1215_s24  ;;  %s1274_s7 = scalar_lea.hbm (!%p215_p12), %s1273_s6, 240 }
  0x2e   : > { %v275_v15 = vld [vmem:[%s1400_s30] sm:$0xf]  ;;  %vm303_vm0 = vcmask 1041408   ;;  %v276_v16 = vld [vmem:[%s1400_s30 + $0x4] sm:$0xf]  ;;  %vm299_vm1 = vcmask 31744   ;;  %p1275_p13 = scmp.ne.s32.totalorder %s1273_s6, %s1274_s7  ;;  %p1279_p2 = scmp.lt.s32.totalorder %s1273_s6, %s1595_s2 }
  0x2f   : > { %296 = vst [vmem:[#allocation1] ss:$4 sm:$0xff] %v275_v15  ;;  %v1197_v21 = vld [vmem:[%s1593_s0] sm:$0xff]  ;;  %v277_v22 = vld [vmem:[%s1400_s30 + $0x8] sm:$0xf]  ;;  %v1200_v39 = vld [vmem:[%s1593_s0 + $0x18] sm:$0xff] }
  0x30   : > { %v1198_v27 = vld [vmem:[%s1593_s0 + $0x8] sm:$0xff]  ;;  %v278_v28 = vld [vmem:[%s1400_s30 + $0xc] sm:$0xf]  ;;  %v279_v34 = vld [vmem:[%s1400_s30 + $0x10] sm:$0xf]  ;;  %s1025_s4 = sshll.u32 %s1523_s25, 4  ;;  %p1276_p0 = pnand %p1275_p13, %p1378_p6  ;;  %s1026_s4 = int_to_ptr.vmem [resolvable:$true] %s1025_s4 }
  0x31   : > { %v1199_v33 = vld [vmem:[%s1593_s0 + $0x10] sm:$0xff]  ;;  %v280_v40 = vld [vmem:[%s1400_s30 + $0x14] sm:$0xf]  ;;  %v1201_v45 = vld [vmem:[%s1593_s0 + $0x20] sm:$0xff]  ;;  %s1278_s16 = scalar_lea.hbm %s1595_s2, 480 }
  0x32   : > { %v281_v46 = vld [vmem:[%s1400_s30 + $0x18] sm:$0xf]  ;;  %v1202_v51 = vld [vmem:[%s1593_s0 + $0x28] sm:$0xff]  ;;  %v282_v52 = vld [vmem:[%s1400_s30 + $0x1c] sm:$0xf]  ;;  %p1277_p1 = pneg %p1276_p0  ;;  %p1280_p3 = scmp.lt.s32.totalorder %s1278_s16, %s1274_s7 }
  0x33   : > { %v1203_v57 = vld [vmem:[%s1593_s0 + $0x30] sm:$0xff]  ;;  %v283_v58 = vld [vmem:[%s1400_s30 + $0x20] sm:$0xf]  ;;  %v1204_v63 = vld [vmem:[%s1593_s0 + $0x38] sm:$0xff] }
  0x34   : > { %v284_v0 = vld [vmem:[%s1400_s30 + $0x24] sm:$0xf]  ;;  %v1205_v5 = vld [vmem:[%s1593_s0 + $0x40] sm:$0xff]  ;;  %v285_v6 = vld [vmem:[%s1400_s30 + $0x28] sm:$0xf]  ;;  %p1281_p4 = por %p1280_p3, %p1279_p2 }
  0x35   : > { %v1206_v11 = vld [vmem:[%s1593_s0 + $0x48] sm:$0xff]  ;;  %v286_v12 = vld [vmem:[%s1400_s30 + $0x2c] sm:$0xf] }
  0x36   : > { %v297_v17 = vld.sshfl [vmem:[#allocation1] sm:$0xff pattern:$0x73625140]  ;;  %v298_v18 = vld.sshfl [vmem:[#allocation1 + $0x8] sm:$0xff pattern:$0x73625140]  ;;  %p1282_p5 = pnand %p1281_p4, %p1277_p1 }
  0x37   : > { %v304_v19 = vsel %vm303_vm0, %v297_v17, 0  ;;  %v306_v20 = vsel %vm303_vm0, %v298_v18, 0  ;;  %342 = vst [vmem:[#allocation1] ss:$4 sm:$0xff] %v276_v16  ;;  %v1207_v17 = vld [vmem:[%s1593_s0 + $0x50] sm:$0xff] }
  0x38   : > { %315 = vmatpush.bf16.msra.mxu0 %v304_v19  ;;  %329 = vmatpush.bf16.msra.mxu1 %v306_v20  ;;  %v287_v18 = vld [vmem:[%s1400_s30 + $0x30] sm:$0xf] }
  0x3b   : > { %1106 = vmatmul.msk.bf16.vlgmr.msra.gmra.mxu0 %vm299_vm1, %v1197_v21  ;;  %1107 = vmatmul.msk.bf16.vlgmr.msra.gmra.mxu1 %vm299_vm1, %v1197_v21 }
  0x3e   : > { %v343_v23 = vld.sshfl [vmem:[#allocation1] sm:$0xff pattern:$0x73625140]  ;;  %v344_v24 = vld.sshfl [vmem:[#allocation1 + $0x8] sm:$0xff pattern:$0x73625140] }
  0x3f   : > { %v348_v25 = vsel %vm303_vm0, %v343_v23, 0  ;;  %v350_v26 = vsel %vm303_vm0, %v344_v24, 0  ;;  %386 = vst [vmem:[#allocation1] ss:$4 sm:$0xff] %v277_v22  ;;  %v1208_v23 = vld [vmem:[%s1593_s0 + $0x58] sm:$0xff] }
  0x40   : > { %359 = vmatpush.bf16.msra.mxu2 %v348_v25  ;;  %373 = vmatpush.bf16.msra.mxu3 %v350_v26  ;;  %v288_v24 = vld [vmem:[%s1400_s30 + $0x34] sm:$0xf] }
  0x43   : > { %1112 = vmatmul.msk.bf16.vlgmr.msra.gmra.mxu2 %vm299_vm1, %v1198_v27  ;;  %1113 = vmatmul.msk.bf16.vlgmr.msra.gmra.mxu3 %vm299_vm1, %v1198_v27 }
  0x46   : > { %v387_v29 = vld.sshfl [vmem:[#allocation1] sm:$0xff pattern:$0x73625140]  ;;  %v388_v30 = vld.sshfl [vmem:[#allocation1 + $0x8] sm:$0xff pattern:$0x73625140] }
  0x47   : > { %v392_v31 = vsel %vm303_vm0, %v387_v29, 0  ;;  %v394_v32 = vsel %vm303_vm0, %v388_v30, 0  ;;  %430 = vst [vmem:[#allocation1] ss:$4 sm:$0xff] %v278_v28  ;;  %v1209_v29 = vld [vmem:[%s1593_s0 + $0x60] sm:$0xff] }
  0x48   : > { %403 = vmatpush.bf16.msrb.mxu0 %v392_v31  ;;  %417 = vmatpush.bf16.msrb.mxu1 %v394_v32  ;;  %v289_v30 = vld [vmem:[%s1400_s30 + $0x38] sm:$0xf] }
  0x4b   : > { %1118 = vmatmul.msk.bf16.vlgmr.msrb.gmra.mxu0 %vm299_vm1, %v1199_v33  ;;  %1119 = vmatmul.msk.bf16.vlgmr.msrb.gmra.mxu1 %vm299_vm1, %v1199_v33 }
  0x4e   : > { %v431_v35 = vld.sshfl [vmem:[#allocation1] sm:$0xff pattern:$0x73625140]  ;;  %v432_v36 = vld.sshfl [vmem:[#allocation1 + $0x8] sm:$0xff pattern:$0x73625140] }
  0x4f   : > { %v436_v37 = vsel %vm303_vm0, %v431_v35, 0  ;;  %v438_v38 = vsel %vm303_vm0, %v432_v36, 0  ;;  %474 = vst [vmem:[#allocation1] ss:$4 sm:$0xff] %v279_v34  ;;  %v1210_v35 = vld [vmem:[%s1593_s0 + $0x68] sm:$0xff] }
  0x50   : > { %447 = vmatpush.bf16.msrb.mxu2 %v436_v37  ;;  %461 = vmatpush.bf16.msrb.mxu3 %v438_v38 }
  0x53   : > { %1124 = vmatmul.msk.bf16.vlgmr.msrb.gmra.mxu2 %vm299_vm1, %v1200_v39  ;;  %1125 = vmatmul.msk.bf16.vlgmr.msrb.gmra.mxu3 %vm299_vm1, %v1200_v39 }
  0x56   : > { %v475_v41 = vld.sshfl [vmem:[#allocation1] sm:$0xff pattern:$0x73625140]  ;;  %v476_v42 = vld.sshfl [vmem:[#allocation1 + $0x8] sm:$0xff pattern:$0x73625140] }
  0x57   : > { %v480_v43 = vsel %vm303_vm0, %v475_v41, 0  ;;  %v482_v44 = vsel %vm303_vm0, %v476_v42, 0  ;;  %518 = vst [vmem:[#allocation1] ss:$4 sm:$0xff] %v280_v40  ;;  %v1211_v40 = vld [vmem:[%s1593_s0 + $0x70] sm:$0xff] }
  0x58   : > { %491 = vmatpush.bf16.msra.mxu0 %v480_v43  ;;  %505 = vmatpush.bf16.msra.mxu1 %v482_v44 }
  0x5b   : > { %1130 = vmatmul.msk.bf16.vlgmr.msra.gmra.mxu0 %vm299_vm1, %v1201_v45  ;;  %1131 = vmatmul.msk.bf16.vlgmr.msra.gmra.mxu1 %vm299_vm1, %v1201_v45 }
  0x5e   : > { %v519_v47 = vld.sshfl [vmem:[#allocation1] sm:$0xff pattern:$0x73625140]  ;;  %v520_v48 = vld.sshfl [vmem:[#allocation1 + $0x8] sm:$0xff pattern:$0x73625140] }
  0x5f   : > { %v524_v49 = vsel %vm303_vm0, %v519_v47, 0  ;;  %v526_v50 = vsel %vm303_vm0, %v520_v48, 0  ;;  %562 = vst [vmem:[#allocation1] ss:$4 sm:$0xff] %v281_v46 }
  0x60   : > { %535 = vmatpush.bf16.msra.mxu2 %v524_v49  ;;  %549 = vmatpush.bf16.msra.mxu3 %v526_v50 }
  0x63   : > { %1136 = vmatmul.msk.bf16.vlgmr.msra.gmra.mxu2 %vm299_vm1, %v1202_v51  ;;  %1137 = vmatmul.msk.bf16.vlgmr.msra.gmra.mxu3 %vm299_vm1, %v1202_v51 }
  0x66   : > { %v563_v53 = vld.sshfl [vmem:[#allocation1] sm:$0xff pattern:$0x73625140]  ;;  %v564_v54 = vld.sshfl [vmem:[#allocation1 + $0x8] sm:$0xff pattern:$0x73625140] }
  0x67   : > { %v568_v55 = vsel %vm303_vm0, %v563_v53, 0  ;;  %v570_v56 = vsel %vm303_vm0, %v564_v54, 0  ;;  %606 = vst [vmem:[#allocation1] ss:$4 sm:$0xff] %v282_v52 }
  0x68   : > { %579 = vmatpush.bf16.msrb.mxu0 %v568_v55  ;;  %593 = vmatpush.bf16.msrb.mxu1 %v570_v56 }
  0x6b   : > { %1142 = vmatmul.msk.bf16.vlgmr.msrb.gmra.mxu0 %vm299_vm1, %v1203_v57  ;;  %1143 = vmatmul.msk.bf16.vlgmr.msrb.gmra.mxu1 %vm299_vm1, %v1203_v57 }
  0x6e   : > { %v607_v59 = vld.sshfl [vmem:[#allocation1] sm:$0xff pattern:$0x73625140]  ;;  %v608_v60 = vld.sshfl [vmem:[#allocation1 + $0x8] sm:$0xff pattern:$0x73625140] }
  0x6f   : > { %v612_v61 = vsel %vm303_vm0, %v607_v59, 0  ;;  %v614_v62 = vsel %vm303_vm0, %v608_v60, 0  ;;  %650 = vst [vmem:[#allocation1] ss:$4 sm:$0xff] %v283_v58 }
  0x70   : > { %623 = vmatpush.bf16.msrb.mxu2 %v612_v61  ;;  %637 = vmatpush.bf16.msrb.mxu3 %v614_v62 }
  0x73   : > { %1148 = vmatmul.msk.bf16.vlgmr.msrb.gmra.mxu2 %vm299_vm1, %v1204_v63  ;;  %1149 = vmatmul.msk.bf16.vlgmr.msrb.gmra.mxu3 %vm299_vm1, %v1204_v63 }
  0x76   : > { %v651_v1 = vld.sshfl [vmem:[#allocation1] sm:$0xff pattern:$0x73625140]  ;;  %v652_v2 = vld.sshfl [vmem:[#allocation1 + $0x8] sm:$0xff pattern:$0x73625140] }
  0x77   : > { %v656_v3 = vsel %vm303_vm0, %v651_v1, 0  ;;  %v658_v4 = vsel %vm303_vm0, %v652_v2, 0  ;;  %694 = vst [vmem:[#allocation1] ss:$4 sm:$0xff] %v284_v0 }
  0x78   : > { %667 = vmatpush.bf16.msra.mxu0 %v656_v3  ;;  %681 = vmatpush.bf16.msra.mxu1 %v658_v4 }
  0x7b   : > { %1154 = vmatmul.msk.bf16.vlgmr.msra.gmra.mxu0 %vm299_vm1, %v1205_v5  ;;  %1155 = vmatmul.msk.bf16.vlgmr.msra.gmra.mxu1 %vm299_vm1, %v1205_v5 }
  0x7e   : > { %v695_v7 = vld.sshfl [vmem:[#allocation1] sm:$0xff pattern:$0x73625140]  ;;  %v696_v8 = vld.sshfl [vmem:[#allocation1 + $0x8] sm:$0xff pattern:$0x73625140] }
  0x7f   : > { %v700_v9 = vsel %vm303_vm0, %v695_v7, 0  ;;  %v702_v10 = vsel %vm303_vm0, %v696_v8, 0  ;;  %738 = vst [vmem:[#allocation1] ss:$4 sm:$0xff] %v285_v6 }
  0x80   : > { %711 = vmatpush.bf16.msra.mxu2 %v700_v9  ;;  %725 = vmatpush.bf16.msra.mxu3 %v702_v10 }
  0x83   : > { %1160 = vmatmul.msk.bf16.vlgmr.msra.gmra.mxu2 %vm299_vm1, %v1206_v11  ;;  %1161 = vmatmul.msk.bf16.vlgmr.msra.gmra.mxu3 %vm299_vm1, %v1206_v11 }
  0x86   : > { %v739_v13 = vld.sshfl [vmem:[#allocation1] sm:$0xff pattern:$0x73625140]  ;;  %v740_v14 = vld.sshfl [vmem:[#allocation1 + $0x8] sm:$0xff pattern:$0x73625140] }
  0x87   : > { %v744_v15 = vsel %vm303_vm0, %v739_v13, 0  ;;  %v746_v16 = vsel %vm303_vm0, %v740_v14, 0  ;;  %782 = vst [vmem:[#allocation1] ss:$4 sm:$0xff] %v286_v12 }
  0x88   : > { %755 = vmatpush.bf16.msrb.mxu0 %v744_v15  ;;  %769 = vmatpush.bf16.msrb.mxu1 %v746_v16 }
  0x8b   : > { %1166 = vmatmul.msk.bf16.vlgmr.msrb.gmra.mxu0 %vm299_vm1, %v1207_v17  ;;  %1167 = vmatmul.msk.bf16.vlgmr.msrb.gmra.mxu1 %vm299_vm1, %v1207_v17 }
  0x8e   : > { %v783_v19 = vld.sshfl [vmem:[#allocation1] sm:$0xff pattern:$0x73625140]  ;;  %v784_v20 = vld.sshfl [vmem:[#allocation1 + $0x8] sm:$0xff pattern:$0x73625140] }
  0x8f   : > { %v788_v21 = vsel %vm303_vm0, %v783_v19, 0  ;;  %v790_v22 = vsel %vm303_vm0, %v784_v20, 0  ;;  %826 = vst [vmem:[#allocation1] ss:$4 sm:$0xff] %v287_v18 }
  0x90   : > { %799 = vmatpush.bf16.msrb.mxu2 %v788_v21  ;;  %813 = vmatpush.bf16.msrb.mxu3 %v790_v22 }
  0x93   : > { %1172 = vmatmul.msk.bf16.vlgmr.msrb.gmra.mxu2 %vm299_vm1, %v1208_v23  ;;  %1173 = vmatmul.msk.bf16.vlgmr.msrb.gmra.mxu3 %vm299_vm1, %v1208_v23 }
  0x96   : > { %v827_v25 = vld.sshfl [vmem:[#allocation1] sm:$0xff pattern:$0x73625140]  ;;  %v828_v26 = vld.sshfl [vmem:[#allocation1 + $0x8] sm:$0xff pattern:$0x73625140] }
  0x97   : > { %v832_v27 = vsel %vm303_vm0, %v827_v25, 0  ;;  %v834_v28 = vsel %vm303_vm0, %v828_v26, 0  ;;  %870 = vst [vmem:[#allocation1] ss:$4 sm:$0xff] %v288_v24 }
  0x98   : > { %843 = vmatpush.bf16.msra.mxu0 %v832_v27  ;;  %857 = vmatpush.bf16.msra.mxu1 %v834_v28 }
  0x9b   : > { %1178 = vmatmul.msk.bf16.vlgmr.msra.gmra.mxu0 %vm299_vm1, %v1209_v29  ;;  %1179 = vmatmul.msk.bf16.vlgmr.msra.gmra.mxu1 %vm299_vm1, %v1209_v29 }
  0x9e   : > { %v871_v31 = vld.sshfl [vmem:[#allocation1] sm:$0xff pattern:$0x73625140]  ;;  %v872_v32 = vld.sshfl [vmem:[#allocation1 + $0x8] sm:$0xff pattern:$0x73625140] }
  0x9f   : > { %v876_v33 = vsel %vm303_vm0, %v871_v31, 0  ;;  %v878_v34 = vsel %vm303_vm0, %v872_v32, 0  ;;  %914 = vst [vmem:[#allocation1] ss:$4 sm:$0xff] %v289_v30 }
  0xa0   : > { %887 = vmatpush.bf16.msra.mxu2 %v876_v33  ;;  %901 = vmatpush.bf16.msra.mxu3 %v878_v34 }
  0xa3   : > { %1184 = vmatmul.msk.bf16.vlgmr.msra.gmra.mxu2 %vm299_vm1, %v1210_v35  ;;  %1185 = vmatmul.msk.bf16.vlgmr.msra.gmra.mxu3 %vm299_vm1, %v1210_v35 }
  0xa6   : > { %v915_v36 = vld.sshfl [vmem:[#allocation1] sm:$0xff pattern:$0x73625140]  ;;  %v916_v37 = vld.sshfl [vmem:[#allocation1 + $0x8] sm:$0xff pattern:$0x73625140] }
  0xa7   : > { %v920_v38 = vsel %vm303_vm0, %v915_v36, 0  ;;  %v922_v39 = vsel %vm303_vm0, %v916_v37, 0 }
  0xa8   : > { %931 = vmatpush.bf16.msrb.mxu0 %v920_v38  ;;  %945 = vmatpush.bf16.msrb.mxu1 %v922_v39 }
  0xab   : > { %1190 = vmatmul.msk.bf16.vlgmr.msrb.gmra.mxu0 %vm299_vm1, %v1211_v40  ;;  %1191 = vmatmul.msk.bf16.vlgmr.msrb.gmra.mxu1 %vm299_vm1, %v1211_v40 }
  0xb8   : > { %v317_v41 = vpop.f32.mrf.mxu0  ;;  %v331_v42 = vpop.f32.mrf.mxu1 }
  0xb9   : > { %v952_v43 = vpack.c.bf16 %v331_v42, %v317_v41 }
  0xbb   : > { %982 = vst [vmem:[%s1523_s25] sm:$0xff] %v952_v43 }
  0xc0   : > { %v319_v44 = vpop.f32.mrf.mxu0  ;;  %v333_v45 = vpop.f32.mrf.mxu1 }
  0xc1   : > { %v953_v46 = vpack.c.bf16 %v333_v45, %v319_v44 }
  0xc3   : > { %983 = vst [vmem:[%s1523_s25 + $0x8] sm:$0xff] %v953_v46 }
  0xc6   : > { %v361_v47 = vpop.f32.mrf.mxu2  ;;  %v375_v48 = vpop.f32.mrf.mxu3 }
  0xc7   : > { %v954_v49 = vpack.c.bf16 %v375_v48, %v361_v47 }
  0xc8   : > { %v405_v50 = vpop.f32.mrf.mxu0  ;;  %v419_v51 = vpop.f32.mrf.mxu1 }
  0xc9   : > { %984 = vst [vmem:[%s1523_s25 + $0x10] sm:$0xff] %v954_v49  ;;  %v956_v52 = vpack.c.bf16 %v419_v51, %v405_v50 }
  0xcb   : > { %986 = vst [vmem:[%s1523_s25 + $0x20] sm:$0xff] %v956_v52 }
  0xce   : > { %v363_v53 = vpop.f32.mrf.mxu2  ;;  %v377_v54 = vpop.f32.mrf.mxu3 }
  0xcf   : > { %v955_v55 = vpack.c.bf16 %v377_v54, %v363_v53 }
  0xd0   : > { %v407_v56 = vpop.f32.mrf.mxu0  ;;  %v421_v57 = vpop.f32.mrf.mxu1 }
  0xd1   : > { %985 = vst [vmem:[%s1523_s25 + $0x18] sm:$0xff] %v955_v55  ;;  %v957_v58 = vpack.c.bf16 %v421_v57, %v407_v56 }
  0xd3   : > { %987 = vst [vmem:[%s1523_s25 + $0x28] sm:$0xff] %v957_v58 }
  0xd6   : > { %v449_v59 = vpop.f32.mrf.mxu2  ;;  %v463_v60 = vpop.f32.mrf.mxu3 }
  0xd7   : > { %v958_v61 = vpack.c.bf16 %v463_v60, %v449_v59 }
  0xd8   : > { %v493_v62 = vpop.f32.mrf.mxu0  ;;  %v507_v63 = vpop.f32.mrf.mxu1 }
  0xd9   : > { %988 = vst [vmem:[%s1523_s25 + $0x30] sm:$0xff] %v958_v61  ;;  %v960_v0 = vpack.c.bf16 %v507_v63, %v493_v62 }
  0xdb   : > { %990 = vst [vmem:[%s1523_s25 + $0x40] sm:$0xff] %v960_v0 }
  0xde   : > { %v451_v1 = vpop.f32.mrf.mxu2  ;;  %v465_v2 = vpop.f32.mrf.mxu3 }
  0xdf   : > { %v959_v3 = vpack.c.bf16 %v465_v2, %v451_v1 }
  0xe0   : > { %v495_v4 = vpop.f32.mrf.mxu0  ;;  %v509_v5 = vpop.f32.mrf.mxu1 }
  0xe1   : > { %989 = vst [vmem:[%s1523_s25 + $0x38] sm:$0xff] %v959_v3  ;;  %v961_v6 = vpack.c.bf16 %v509_v5, %v495_v4 }
  0xe3   : > { %991 = vst [vmem:[%s1523_s25 + $0x48] sm:$0xff] %v961_v6 }
  0xe6   : > { %v537_v7 = vpop.f32.mrf.mxu2  ;;  %v551_v8 = vpop.f32.mrf.mxu3 }
  0xe7   : > { %v962_v9 = vpack.c.bf16 %v551_v8, %v537_v7 }
  0xe8   : > { %v581_v10 = vpop.f32.mrf.mxu0  ;;  %v595_v11 = vpop.f32.mrf.mxu1 }
  0xe9   : > { %992 = vst [vmem:[%s1523_s25 + $0x50] sm:$0xff] %v962_v9  ;;  %v964_v12 = vpack.c.bf16 %v595_v11, %v581_v10 }
  0xeb   : > { %994 = vst [vmem:[%s1523_s25 + $0x60] sm:$0xff] %v964_v12 }
  0xee   : > { %v539_v13 = vpop.f32.mrf.mxu2  ;;  %v553_v14 = vpop.f32.mrf.mxu3 }
  0xef   : > { %v963_v15 = vpack.c.bf16 %v553_v14, %v539_v13 }
  0xf0   : > { %v583_v16 = vpop.f32.mrf.mxu0  ;;  %v597_v17 = vpop.f32.mrf.mxu1 }
  0xf1   : > { %993 = vst [vmem:[%s1523_s25 + $0x58] sm:$0xff] %v963_v15  ;;  %v965_v18 = vpack.c.bf16 %v597_v17, %v583_v16 }
  0xf3   : > { %995 = vst [vmem:[%s1523_s25 + $0x68] sm:$0xff] %v965_v18 }
  0xf6   : > { %v625_v19 = vpop.f32.mrf.mxu2  ;;  %v639_v20 = vpop.f32.mrf.mxu3 }
  0xf7   : > { %v966_v21 = vpack.c.bf16 %v639_v20, %v625_v19 }
  0xf8   : > { %v669_v22 = vpop.f32.mrf.mxu0  ;;  %v683_v23 = vpop.f32.mrf.mxu1 }
  0xf9   : > { %996 = vst [vmem:[%s1523_s25 + $0x70] sm:$0xff] %v966_v21  ;;  %v968_v24 = vpack.c.bf16 %v683_v23, %v669_v22 }
  0xfb   : > { %998 = vst [vmem:[%s1523_s25 + $0x80] sm:$0xff] %v968_v24 }
  0xfe   : > { %v627_v25 = vpop.f32.mrf.mxu2  ;;  %v641_v26 = vpop.f32.mrf.mxu3 }
  0xff   : > { %v967_v27 = vpack.c.bf16 %v641_v26, %v627_v25 }
 0x100   : > { %v671_v28 = vpop.f32.mrf.mxu0  ;;  %v685_v29 = vpop.f32.mrf.mxu1 }
 0x101   : > { %997 = vst [vmem:[%s1523_s25 + $0x78] sm:$0xff] %v967_v27  ;;  %v969_v30 = vpack.c.bf16 %v685_v29, %v671_v28 }
 0x103   : > { %999 = vst [vmem:[%s1523_s25 + $0x88] sm:$0xff] %v969_v30 }
 0x106   : > { %v713_v31 = vpop.f32.mrf.mxu2  ;;  %v727_v32 = vpop.f32.mrf.mxu3 }
 0x107   : > { %v970_v33 = vpack.c.bf16 %v727_v32, %v713_v31 }
 0x108   : > { %v757_v34 = vpop.f32.mrf.mxu0  ;;  %v771_v35 = vpop.f32.mrf.mxu1 }
 0x109   : > { %1000 = vst [vmem:[%s1523_s25 + $0x90] sm:$0xff] %v970_v33  ;;  %v972_v36 = vpack.c.bf16 %v771_v35, %v757_v34 }
 0x10b   : > { %1002 = vst [vmem:[%s1523_s25 + $0xa0] sm:$0xff] %v972_v36 }
 0x10e   : > { %v715_v37 = vpop.f32.mrf.mxu2  ;;  %v729_v38 = vpop.f32.mrf.mxu3 }
 0x10f   : > { %v971_v39 = vpack.c.bf16 %v729_v38, %v715_v37 }
 0x110   : > { %v759_v40 = vpop.f32.mrf.mxu0  ;;  %v773_v41 = vpop.f32.mrf.mxu1 }
 0x111   : > { %1001 = vst [vmem:[%s1523_s25 + $0x98] sm:$0xff] %v971_v39  ;;  %v973_v42 = vpack.c.bf16 %v773_v41, %v759_v40 }
 0x113   : > { %1003 = vst [vmem:[%s1523_s25 + $0xa8] sm:$0xff] %v973_v42 }
 0x116   : > { %v801_v43 = vpop.f32.mrf.mxu2  ;;  %v815_v44 = vpop.f32.mrf.mxu3 }
 0x117   : > { %v974_v45 = vpack.c.bf16 %v815_v44, %v801_v43 }
 0x118   : > { %v845_v46 = vpop.f32.mrf.mxu0  ;;  %v859_v47 = vpop.f32.mrf.mxu1 }
 0x119   : > { %1004 = vst [vmem:[%s1523_s25 + $0xb0] sm:$0xff] %v974_v45  ;;  %v976_v48 = vpack.c.bf16 %v859_v47, %v845_v46 }
 0x11b   : > { %1006 = vst [vmem:[%s1523_s25 + $0xc0] sm:$0xff] %v976_v48 }
 0x11e   : > { %v803_v49 = vpop.f32.mrf.mxu2  ;;  %v817_v50 = vpop.f32.mrf.mxu3 }
 0x11f   : > { %v975_v51 = vpack.c.bf16 %v817_v50, %v803_v49 }
 0x120   : > { %v847_v52 = vpop.f32.mrf.mxu0  ;;  %v861_v53 = vpop.f32.mrf.mxu1 }
 0x121   : > { %1005 = vst [vmem:[%s1523_s25 + $0xb8] sm:$0xff] %v975_v51  ;;  %v977_v54 = vpack.c.bf16 %v861_v53, %v847_v52 }
 0x123   : > { %1007 = vst [vmem:[%s1523_s25 + $0xc8] sm:$0xff] %v977_v54 }
 0x126   : > { %v889_v55 = vpop.f32.mrf.mxu2  ;;  %v903_v56 = vpop.f32.mrf.mxu3 }
 0x127   : > { %v978_v57 = vpack.c.bf16 %v903_v56, %v889_v55 }
 0x128   : > { %v933_v58 = vpop.f32.mrf.mxu0  ;;  %v947_v59 = vpop.f32.mrf.mxu1 }
 0x129   : > { %1008 = vst [vmem:[%s1523_s25 + $0xd0] sm:$0xff] %v978_v57  ;;  %v980_v60 = vpack.c.bf16 %v947_v59, %v933_v58 }
 0x12b   : > { %1010 = vst [vmem:[%s1523_s25 + $0xe0] sm:$0xff] %v980_v60 }
 0x12e   : > { %v891_v61 = vpop.f32.mrf.mxu2  ;;  %v905_v62 = vpop.f32.mrf.mxu3 }
 0x12f   : > { %v979_v63 = vpack.c.bf16 %v905_v62, %v891_v61 }
 0x130   : > { %v935_v0 = vpop.f32.mrf.mxu0  ;;  %v949_v1 = vpop.f32.mrf.mxu1 }
 0x131   : > { %1009 = vst [vmem:[%s1523_s25 + $0xd8] sm:$0xff] %v979_v63  ;;  %v981_v2 = vpack.c.bf16 %v949_v1, %v935_v0 }
 0x133   : > { %1011 = vst [vmem:[%s1523_s25 + $0xe8] sm:$0xff] %v981_v2 }
 0x134   : > { %1285 = shalt.err (!%p1282_p5)
}
 0x135   : > { %s1322_s28 = smov 128   ;;  %s1323_s22 = smov 256  }
 0x136   : > { %s1324_s30 = smov 8  }
 0x137   : > { %1216 = dma.vmem_to_hbm [thread:$0]  (%p1378_p6), %s1026_s4, 3840, %s1028_s5, %s1013_s13, %s1322_s28, %s1323_s22, %s1324_s30  }
 0x138 PF: > { %s1042_s23 = sand.u32 1, %s1308_s9   ;;  %p1219_p7 = pnand %p1098_p9, %p1382_p8 }
 0x139   : > { %s1043_s24 = scalar_lea.sflag [#allocation4], %s1042_s23 }
 0x13a   : > { %p1220_p10 = pneg %p1219_p7 }
 0x13c   : > { %1303 = dma.done.wait (%p1220_p10), %s1043_s24, 3840  }
 0x13d   : > { %1305 = vsyncadd (%p1220_p10), %s1043_s24, 4294963456  ;;  %p12_p11 = scmp.ge.s32.totalorder %s1363_s15, 4   ;;  %s1598_s9 = smov %s1312_s10 }
 0x13e   : > { %s1599_s10 = smov %s1316_s11  ;;  %s1600_s11 = smov %s1376_s18 }
 0x13f   : > { %s1601_s12 = smov %s1363_s15  ;;  %14 = sbr.rel (!%p12_p11) target bundleno = 3 (0x3), region = 109 }
 0x144   :  { %1049 = vsyncpa [#allocation4], 1 }
 0x145   :  { %1051 = vsyncpa [#allocation4 + $0x1], 1 }

</bundles_post_ra>
